<compile_context>
chip_gen: v7x
topology: tpu7x:2x2x1
jax: 0.10.0
libtpu: 0.0.40
codegen_flags: <defaults>
</compile_context>

<pallas_src>
import jax
import jax.numpy as jnp
from jax.experimental import pallas as pl
from jax.experimental.pallas import tpu as pltpu

LANE = 128


def _round_up(x, m):
    return (x + m - 1) // m * m


# ----------------------------- Pallas kernel --------------------------------
def cls_head_kernel(sen1_ref, sen2_ref,                   # (tb, D) bf16 gathered rows
                    w3_ref, b3_ref, w4_ref, b4_ref,       # (D, D) bf16, (1, D) f32
                    w1_ref, b1_ref, w2_ref, b2_ref,       # (D, 128) bf16, (1, 128) f32
                    out1_ref, out2_ref):                  # (tb, 128) f32, lane-dense
    # sen = tanh(linear3/4(sen))   (matmul -> MXU bf16, tanh -> EUP, f32 math)
    h1 = jnp.tanh(jnp.dot(sen1_ref[...], w3_ref[...],
                          preferred_element_type=jnp.float32) + b3_ref[...])
    h2 = jnp.tanh(jnp.dot(sen2_ref[...], w4_ref[...],
                          preferred_element_type=jnp.float32) + b4_ref[...])

    # Final classifier linears: weights padded to 128 lanes -> N=128 matmuls
    # and full-width (unmasked) stores of the (tb, 128) output slabs.
    out1_ref[...] = jnp.dot(h1.astype(jnp.bfloat16), w1_ref[...],
                            preferred_element_type=jnp.float32) + b1_ref[...]
    out2_ref[...] = jnp.dot(h2.astype(jnp.bfloat16), w2_ref[...],
                            preferred_element_type=jnp.float32) + b2_ref[...]


def cls_head(hidden, idx1, idx2, params, *, tb=128):
    """hidden: (B, S, D) f32; idx1, idx2: (B,) int; params: dict of weights.

    Weights are stored as (in_features, out_features) == torch_weight.T so the
    kernel computes y = x @ W + b, matching PyTorch's y = x @ W_torch.T + b.
    """
    B, S, D = hidden.shape
    n1 = params["w1"].shape[1]
    n2 = params["w2"].shape[1]
    assert n1 <= LANE and n2 <= LANE

    # ---- Gather the 2*B hidden-state rows in the wrapper (tiny XLA gather);
    # the Pallas input pipeline then streams/overlaps them automatically.
    # NOTE: torch.gather would raise on out-of-range indices; we clamp.
    idx1c = jnp.clip(idx1.astype(jnp.int32), 0, S - 1)
    idx2c = jnp.clip(idx2.astype(jnp.int32), 0, S - 1)
    sen1 = jnp.take_along_axis(hidden, idx1c[:, None, None], axis=1)[:, 0, :]
    sen2 = jnp.take_along_axis(hidden, idx2c[:, None, None], axis=1)[:, 0, :]

    # ---- Batch tiling: one big step for small B, 128-row blocks otherwise.
    tb = max(8, _round_up(min(tb, 128), 8))
    b_pad_min = _round_up(B, 8)
    if b_pad_min <= tb:
        tb = b_pad_min           # single grid step, no wasted tiny steps
        B_pad = b_pad_min
    else:
        B_pad = _round_up(B, tb)
    pad = B_pad - B

    sen1 = jnp.pad(sen1, ((0, pad), (0, 0))).astype(jnp.bfloat16)
    sen2 = jnp.pad(sen2, ((0, pad), (0, 0))).astype(jnp.bfloat16)

    # ---- Weight prep: bf16 matmul operands, f32 biases, heads padded to 128.
    w3 = params["w3"].astype(jnp.bfloat16)
    w4 = params["w4"].astype(jnp.bfloat16)
    b3 = params["b3"].reshape(1, D).astype(jnp.float32)
    b4 = params["b4"].reshape(1, D).astype(jnp.float32)
    w1p = jnp.zeros((D, LANE), jnp.bfloat16).at[:, :n1].set(
        params["w1"].astype(jnp.bfloat16))
    b1p = jnp.zeros((1, LANE), jnp.float32).at[0, :n1].set(params["b1"])
    w2p = jnp.zeros((D, LANE), jnp.bfloat16).at[:, :n2].set(
        params["w2"].astype(jnp.bfloat16))
    b2p = jnp.zeros((1, LANE), jnp.float32).at[0, :n2].set(params["b2"])

    const = lambda bb: (0, 0)     # weight / bias blocks stay VMEM-resident
    batch = lambda bb: (bb, 0)    # gathered rows / outputs stream over batch

    out1, out2 = pl.pallas_call(
        cls_head_kernel,
        out_shape=(jax.ShapeDtypeStruct((B_pad, LANE), jnp.float32),
                   jax.ShapeDtypeStruct((B_pad, LANE), jnp.float32)),
        grid_spec=pltpu.PrefetchScalarGridSpec(
            num_scalar_prefetch=0,
            grid=(B_pad // tb,),
            in_specs=[
                pl.BlockSpec((tb, D), batch),              # sen1 rows
                pl.BlockSpec((tb, D), batch),              # sen2 rows
                pl.BlockSpec((D, D), const),               # w3
                pl.BlockSpec((1, D), const),               # b3
                pl.BlockSpec((D, D), const),               # w4
                pl.BlockSpec((1, D), const),               # b4
                pl.BlockSpec((D, LANE), const),            # w1 (padded)
                pl.BlockSpec((1, LANE), const),            # b1 (padded)
                pl.BlockSpec((D, LANE), const),            # w2 (padded)
                pl.BlockSpec((1, LANE), const),            # b2 (padded)
            ],
            out_specs=(
                pl.BlockSpec((tb, LANE), batch),
                pl.BlockSpec((tb, LANE), batch),
            ),
        ),
        compiler_params=pltpu.CompilerParams(
            dimension_semantics=("parallel",),
            vmem_limit_bytes=64 << 20,
        ),
    )(sen1, sen2, w3, b3, w4, b4, w1p, b1p, w2p, b2p)

    return out1[:B, :n1], out2[:B, :n2]


# ------------------------ plain-JAX glue / backbone stub --------------------
def roberta_stub(input_ids, attention_mask, tok_emb, pos_emb):
    # TODO(synk): stand-in for the pretrained RoBERTa encoder (embeddings only).
    hs = tok_emb[input_ids] + pos_emb[None, : input_ids.shape[1], :]
    return hs * attention_mask[..., None].astype(hs.dtype)     # (B, S, D)


def make_params(key, dim, n1, n2, vocab_size, max_seq):
    ks = jax.random.split(key, 8)
    s = 0.02
    return {
        "tok_emb": jax.random.normal(ks[0], (vocab_size, dim), jnp.float32) * s,
        "pos_emb": jax.random.normal(ks[1], (max_seq, dim), jnp.float32) * s,
        # stored as (in, out) == torch_weight.T
        "w3": jax.random.normal(ks[2], (dim, dim), jnp.float32) * s,
        "b3": jnp.zeros((dim,), jnp.float32),
        "w4": jax.random.normal(ks[3], (dim, dim), jnp.float32) * s,
        "b4": jnp.zeros((dim,), jnp.float32),
        "w1": jax.random.normal(ks[4], (dim, n1), jnp.float32) * s,
        "b1": jax.random.normal(ks[5], (n1,), jnp.float32) * s,
        "w2": jax.random.normal(ks[6], (dim, n2), jnp.float32) * s,
        "b2": jax.random.normal(ks[7], (n2,), jnp.float32) * s,
    }


def reference_head(hidden, idx1, idx2, p):
    # pure-JAX f32 reference for the Pallas kernel
    sen1 = jnp.take_along_axis(hidden, idx1[:, None, None], axis=1)[:, 0, :]
    sen2 = jnp.take_along_axis(hidden, idx2[:, None, None], axis=1)[:, 0, :]
    sen1 = jnp.tanh(sen1 @ p["w3"] + p["b3"])
    sen2 = jnp.tanh(sen2 @ p["w4"] + p["b4"])
    return sen1 @ p["w1"] + p["b1"], sen2 @ p["w2"] + p["b2"]


def _run_case(key, B, S, D, n1, n2, vocab_size, params):
    k_ids, k_idx1, k_idx2 = jax.random.split(key, 3)
    input_ids = jax.random.randint(k_ids, (B, S), 0, vocab_size, jnp.int32)
    attention_mask = jnp.ones((B, S), jnp.int32)
    idx1 = jax.random.randint(k_idx1, (B,), 0, S, jnp.int32)
    idx2 = jax.random.randint(k_idx2, (B,), 0, S, jnp.int32)

    hidden = roberta_stub(input_ids, attention_mask,
                          params["tok_emb"], params["pos_emb"])

    out1, out2 = cls_head(hidden, idx1, idx2, params)
    jax.block_until_ready((out1, out2))

    ref1, ref2 = reference_head(hidden, idx1, idx2, params)
    assert out1.shape == (B, n1) and out2.shape == (B, n2)
    # bf16 matmul (f32 accumulate) -> relaxed tolerance vs. the f32 reference.
    assert jnp.allclose(out1, ref1, atol=5e-3, rtol=2e-2)
    assert jnp.allclose(out2, ref2, atol=5e-3, rtol=2e-2)


if __name__ == "__main__":
    # Small stand-ins for (batch, seq, 768).
    S, D = 16, 256
    n_sentiment1, n_sentiment2 = 6, 58
    vocab_size = 100

    key = jax.random.PRNGKey(0)
    k_params, k_case1, k_case2 = jax.random.split(key, 3)
    params = make_params(k_params, D, n_sentiment1, n_sentiment2, vocab_size, S)

    # Case 1: tiny batch -> single grid step (whole padded batch at once).
    _run_case(k_case1, 10, S, D, n_sentiment1, n_sentiment2, vocab_size, params)
    # Case 2: larger batch -> multiple 128-row pipelined/parallel grid steps.
    _run_case(k_case2, 300, S, D, n_sentiment1, n_sentiment2, vocab_size, params)

    print("KERNEL_OK")
</pallas_src>

<mosaic_0001>
module attributes {stable_mosaic.version = 11 : i64} {
  func.func @cls_head_kernel(%arg0: i32, %arg1: memref<16x256xbf16, #tpu.memory_space<vmem>>, %arg2: memref<16x256xbf16, #tpu.memory_space<vmem>>, %arg3: memref<256x256xbf16, #tpu.memory_space<vmem>>, %arg4: memref<1x256xf32, #tpu.memory_space<vmem>>, %arg5: memref<256x256xbf16, #tpu.memory_space<vmem>>, %arg6: memref<1x256xf32, #tpu.memory_space<vmem>>, %arg7: memref<256x128xbf16, #tpu.memory_space<vmem>>, %arg8: memref<1x128xf32, #tpu.memory_space<vmem>>, %arg9: memref<256x128xbf16, #tpu.memory_space<vmem>>, %arg10: memref<1x128xf32, #tpu.memory_space<vmem>>, %arg11: memref<16x128xf32, #tpu.memory_space<vmem>>, %arg12: memref<16x128xf32, #tpu.memory_space<vmem>>) attributes {dimension_semantics = [#tpu.dimension_semantics<parallel>], iteration_bounds = array<i64: 1>, scalar_prefetch = 0 : i64, scratch_operands = 0 : i64, tpu.core_type = #tpu.core_type<tc>, window_params = [{transform_indices = @transform_0, window_bounds = array<i64: 16, 256>}, {transform_indices = @transform_1, window_bounds = array<i64: 16, 256>}, {pipeline_mode = #tpu.pipeline_mode<synchronous>, transform_indices = @transform_2, window_bounds = array<i64: 256, 256>}, {pipeline_mode = #tpu.pipeline_mode<synchronous>, transform_indices = @transform_3, window_bounds = array<i64: 1, 256>}, {pipeline_mode = #tpu.pipeline_mode<synchronous>, transform_indices = @transform_4, window_bounds = array<i64: 256, 256>}, {pipeline_mode = #tpu.pipeline_mode<synchronous>, transform_indices = @transform_5, window_bounds = array<i64: 1, 256>}, {pipeline_mode = #tpu.pipeline_mode<synchronous>, transform_indices = @transform_6, window_bounds = array<i64: 256, 128>}, {pipeline_mode = #tpu.pipeline_mode<synchronous>, transform_indices = @transform_7, window_bounds = array<i64: 1, 128>}, {pipeline_mode = #tpu.pipeline_mode<synchronous>, transform_indices = @transform_8, window_bounds = array<i64: 256, 128>}, {pipeline_mode = #tpu.pipeline_mode<synchronous>, transform_indices = @transform_9, window_bounds = array<i64: 1, 128>}, {transform_indices = @transform_10, window_bounds = array<i64: 16, 128>}, {transform_indices = @transform_11, window_bounds = array<i64: 16, 128>}]} {
    %c0 = arith.constant 0 : index
    %c0_0 = arith.constant 0 : index
    %0 = vector.load %arg1[%c0, %c0_0] : memref<16x256xbf16, #tpu.memory_space<vmem>>, vector<16x256xbf16>
    %c0_1 = arith.constant 0 : index
    %c0_2 = arith.constant 0 : index
    %1 = vector.load %arg3[%c0_1, %c0_2] : memref<256x256xbf16, #tpu.memory_space<vmem>>, vector<256x256xbf16>
    %cst = arith.constant dense<0.000000e+00> : vector<16x256xf32>
    %2 = tpu.matmul %0, %1, %cst {dimension_numbers = #tpu.dot_dimension_numbers<[1], [0], [0], [1], [0, 0, 1, 1], [], []>} : vector<16x256xbf16>, vector<256x256xbf16>, vector<16x256xf32> -> vector<16x256xf32>
    %c0_3 = arith.constant 0 : index
    %c0_4 = arith.constant 0 : index
    %3 = vector.load %arg4[%c0_3, %c0_4] : memref<1x256xf32, #tpu.memory_space<vmem>>, vector<1x256xf32>
    %4 = vector.broadcast %3 : vector<1x256xf32> to vector<16x256xf32>
    %5 = arith.addf %2, %4 : vector<16x256xf32>
    %6 = math.tanh %5 : vector<16x256xf32>
    %c0_5 = arith.constant 0 : index
    %c0_6 = arith.constant 0 : index
    %7 = vector.load %arg2[%c0_5, %c0_6] : memref<16x256xbf16, #tpu.memory_space<vmem>>, vector<16x256xbf16>
    %c0_7 = arith.constant 0 : index
    %c0_8 = arith.constant 0 : index
    %8 = vector.load %arg5[%c0_7, %c0_8] : memref<256x256xbf16, #tpu.memory_space<vmem>>, vector<256x256xbf16>
    %cst_9 = arith.constant dense<0.000000e+00> : vector<16x256xf32>
    %9 = tpu.matmul %7, %8, %cst_9 {dimension_numbers = #tpu.dot_dimension_numbers<[1], [0], [0], [1], [0, 0, 1, 1], [], []>} : vector<16x256xbf16>, vector<256x256xbf16>, vector<16x256xf32> -> vector<16x256xf32>
    %c0_10 = arith.constant 0 : index
    %c0_11 = arith.constant 0 : index
    %10 = vector.load %arg6[%c0_10, %c0_11] : memref<1x256xf32, #tpu.memory_space<vmem>>, vector<1x256xf32>
    %11 = vector.broadcast %10 : vector<1x256xf32> to vector<16x256xf32>
    %12 = arith.addf %9, %11 : vector<16x256xf32>
    %13 = math.tanh %12 : vector<16x256xf32>
    %14 = arith.truncf %6 : vector<16x256xf32> to vector<16x256xbf16>
    %c0_12 = arith.constant 0 : index
    %c0_13 = arith.constant 0 : index
    %15 = vector.load %arg7[%c0_12, %c0_13] : memref<256x128xbf16, #tpu.memory_space<vmem>>, vector<256x128xbf16>
    %cst_14 = arith.constant dense<0.000000e+00> : vector<16x128xf32>
    %16 = tpu.matmul %14, %15, %cst_14 {dimension_numbers = #tpu.dot_dimension_numbers<[1], [0], [0], [1], [0, 0, 1, 1], [], []>} : vector<16x256xbf16>, vector<256x128xbf16>, vector<16x128xf32> -> vector<16x128xf32>
    %c0_15 = arith.constant 0 : index
    %c0_16 = arith.constant 0 : index
    %17 = vector.load %arg8[%c0_15, %c0_16] : memref<1x128xf32, #tpu.memory_space<vmem>>, vector<1x128xf32>
    %18 = vector.broadcast %17 : vector<1x128xf32> to vector<16x128xf32>
    %19 = arith.addf %16, %18 : vector<16x128xf32>
    %c0_17 = arith.constant 0 : index
    %c0_18 = arith.constant 0 : index
    %20 = vector.load %arg11[%c0_17, %c0_18] : memref<16x128xf32, #tpu.memory_space<vmem>>, vector<16x128xf32>
    tpu.vector_store %arg11[%c0_17, %c0_18], %19 {strides = array<i32>} : memref<16x128xf32, #tpu.memory_space<vmem>>, vector<16x128xf32>,
    %21 = arith.truncf %13 : vector<16x256xf32> to vector<16x256xbf16>
    %c0_19 = arith.constant 0 : index
    %c0_20 = arith.constant 0 : index
    %22 = vector.load %arg9[%c0_19, %c0_20] : memref<256x128xbf16, #tpu.memory_space<vmem>>, vector<256x128xbf16>
    %cst_21 = arith.constant dense<0.000000e+00> : vector<16x128xf32>
    %23 = tpu.matmul %21, %22, %cst_21 {dimension_numbers = #tpu.dot_dimension_numbers<[1], [0], [0], [1], [0, 0, 1, 1], [], []>} : vector<16x256xbf16>, vector<256x128xbf16>, vector<16x128xf32> -> vector<16x128xf32>
    %c0_22 = arith.constant 0 : index
    %c0_23 = arith.constant 0 : index
    %24 = vector.load %arg10[%c0_22, %c0_23] : memref<1x128xf32, #tpu.memory_space<vmem>>, vector<1x128xf32>
    %25 = vector.broadcast %24 : vector<1x128xf32> to vector<16x128xf32>
    %26 = arith.addf %23, %25 : vector<16x128xf32>
    %c0_24 = arith.constant 0 : index
    %c0_25 = arith.constant 0 : index
    %27 = vector.load %arg12[%c0_24, %c0_25] : memref<16x128xf32, #tpu.memory_space<vmem>>, vector<16x128xf32>
    tpu.vector_store %arg12[%c0_24, %c0_25], %26 {strides = array<i32>} : memref<16x128xf32, #tpu.memory_space<vmem>>, vector<16x128xf32>,
    return
  }
  func.func @transform_0(%arg0: i32) -> (i32, i32) {
    %c0_i32 = arith.constant 0 : i32
    %c0_i32_0 = arith.constant 0 : i32
    return %arg0, %c0_i32 : i32, i32
  }
  func.func @transform_1(%arg0: i32) -> (i32, i32) {
    %c0_i32 = arith.constant 0 : i32
    %c0_i32_0 = arith.constant 0 : i32
    return %arg0, %c0_i32 : i32, i32
  }
  func.func @transform_2(%arg0: i32) -> (i32, i32) {
    %c0_i32 = arith.constant 0 : i32
    %c0_i32_0 = arith.constant 0 : i32
    %c0_i32_1 = arith.constant 0 : i32
    return %c0_i32, %c0_i32_0 : i32, i32
  }
  func.func @transform_3(%arg0: i32) -> (i32, i32) {
    %c0_i32 = arith.constant 0 : i32
    %c0_i32_0 = arith.constant 0 : i32
    %c0_i32_1 = arith.constant 0 : i32
    return %c0_i32, %c0_i32_0 : i32, i32
  }
  func.func @transform_4(%arg0: i32) -> (i32, i32) {
    %c0_i32 = arith.constant 0 : i32
    %c0_i32_0 = arith.constant 0 : i32
    %c0_i32_1 = arith.constant 0 : i32
    return %c0_i32, %c0_i32_0 : i32, i32
  }
  func.func @transform_5(%arg0: i32) -> (i32, i32) {
    %c0_i32 = arith.constant 0 : i32
    %c0_i32_0 = arith.constant 0 : i32
    %c0_i32_1 = arith.constant 0 : i32
    return %c0_i32, %c0_i32_0 : i32, i32
  }
  func.func @transform_6(%arg0: i32) -> (i32, i32) {
    %c0_i32 = arith.constant 0 : i32
    %c0_i32_0 = arith.constant 0 : i32
    %c0_i32_1 = arith.constant 0 : i32
    return %c0_i32, %c0_i32_0 : i32, i32
  }
  func.func @transform_7(%arg0: i32) -> (i32, i32) {
    %c0_i32 = arith.constant 0 : i32
    %c0_i32_0 = arith.constant 0 : i32
    %c0_i32_1 = arith.constant 0 : i32
    return %c0_i32, %c0_i32_0 : i32, i32
  }
  func.func @transform_8(%arg0: i32) -> (i32, i32) {
    %c0_i32 = arith.constant 0 : i32
    %c0_i32_0 = arith.constant 0 : i32
    %c0_i32_1 = arith.constant 0 : i32
    return %c0_i32, %c0_i32_0 : i32, i32
  }
  func.func @transform_9(%arg0: i32) -> (i32, i32) {
    %c0_i32 = arith.constant 0 : i32
    %c0_i32_0 = arith.constant 0 : i32
    %c0_i32_1 = arith.constant 0 : i32
    return %c0_i32, %c0_i32_0 : i32, i32
  }
  func.func @transform_10(%arg0: i32) -> (i32, i32) {
    %c0_i32 = arith.constant 0 : i32
    %c0_i32_0 = arith.constant 0 : i32
    return %arg0, %c0_i32 : i32, i32
  }
  func.func @transform_11(%arg0: i32) -> (i32, i32) {
    %c0_i32 = arith.constant 0 : i32
    %c0_i32_0 = arith.constant 0 : i32
    return %arg0, %c0_i32 : i32, i32
  }
}

</mosaic_0001>

<bundles_post_ra>
// kernel: tpu_custom_call.1
= control target key start
LH: loop header
LB: loop body
LE: loop exit
PB: predicated region body
PF: predicated region fallthrough
CT: control target
= control target key end

     0   :  { %17 = vsyncpa [#allocation3], 0  ;;  %s1943_s0 = inlined_call_operand.hbm [shape: bf16[16,256], index: 0, kind: input, shape index: {}]   ;;  %s1944_s1 = inlined_call_operand.hbm [shape: bf16[16,256], index: 1, kind: input, shape index: {}]   ;;  %s1945_s2 = inlined_call_operand.hbm [shape: bf16[256,256], index: 2, kind: input, shape index: {}]   ;;  %s1946_s3 = inlined_call_operand.hbm [shape: f32[1,256], index: 3, kind: input, shape index: {}]   ;;  %s1947_s4 = inlined_call_operand.hbm [shape: bf16[256,256], index: 4, kind: input, shape index: {}]   ;;  %s1948_s5 = inlined_call_operand.hbm [shape: f32[1,256], index: 5, kind: input, shape index: {}]   ;;  %s1949_s6 = inlined_call_operand.hbm [shape: bf16[256,128], index: 6, kind: input, shape index: {}]   ;;  %s1950_s7 = inlined_call_operand.hbm [shape: f32[1,128], index: 7, kind: input, shape index: {}]   ;;  %s1951_s8 = inlined_call_operand.hbm [shape: bf16[256,128], index: 8, kind: input, shape index: {}]   ;;  %s1952_s9 = inlined_call_operand.hbm [shape: f32[1,128], index: 9, kind: input, shape index: {}]   ;;  %s1953_s10 = inlined_call_operand.hbm [shape: f32[16,128], index: 10, kind: output, shape index: {0}]   ;;  %s1954_s11 = inlined_call_operand.hbm [shape: f32[16,128], index: 11, kind: output, shape index: {1}]  }
   0x1   :  { %18 = vsyncpa [#allocation6], 0 }
   0x2   :  { %19 = vsyncpa [#allocation9], 0 }
   0x3   :  { %20 = vsyncpa [#allocation12], 0 }
   0x4   :  { %21 = vsyncpa [#allocation15], 0 }
   0x5   :  { %22 = vsyncpa [#allocation18], 0 }
   0x6   :  { %23 = vsyncpa [#allocation4], 0 }
   0x7   :  { %24 = vsyncpa [#allocation21], 0  ;;  %s1684_s17 = smov [#allocation5]   ;;  %s1685_s19 = smov [#allocation8]  }
   0x8   :  { %s42_s18 = sshll.u32 %s1684_s17, 4  ;;  %s67_s20 = sshll.u32 %s1685_s19, 4  ;;  %s43_s18 = int_to_ptr.vmem [resolvable:$true] %s42_s18  ;;  %s68_s20 = int_to_ptr.vmem [resolvable:$true] %s67_s20 }
   0x9   :  { %s1404_s23 = scalar_lea.hbm %s1944_s1, 256 }
   0xa   :  { %p1405_p0 = scmp.ne.s32.totalorder %s1944_s1, %s1404_s23  ;;  %p1408_p1 = scmp.lt.u32.totalorder %s1404_s23, %s1944_s1 }
   0xc   :  { %p1410_p2 = pnand %p1408_p1, %p1405_p0 }
   0xe   :  { %1413 = shalt.err (!%p1410_p2)
}
   0xf   :  { %s1414_s28 = scalar_lea.vmem %s43_s18, 256  ;;  %p1419_p4 = scmp.lt.s32.totalorder %s43_s18, %s43_s18 }
  0x10   :  { %p1415_p3 = scmp.ne.s32.totalorder %s43_s18, %s1414_s28  ;;  %p1420_p5 = scmp.lt.s32.totalorder %s1414_s28, %s1414_s28 }
  0x12   :  { %p1421_p6 = por %p1420_p5, %p1419_p4 }
  0x14   :  { %p1422_p7 = pnand %p1421_p6, %p1415_p3 }
  0x16   :  { %1425 = shalt.err (!%p1422_p7)
}
  0x17   :  { %s1686_s29 = smov 128   ;;  %s1687_s30 = smov 8  }
  0x18   :  { %48 = dma.hbm_to_vmem [thread:$0]  %s1944_s1, 256, %s43_s18, [#allocation6], %s1686_s29, %s1686_s29, %s1687_s30  }
  0x19   :  { %s1426_s16 = scalar_lea.hbm %s1946_s3, 32 }
  0x1a   :  { %p1427_p8 = scmp.ne.s32.totalorder %s1946_s3, %s1426_s16  ;;  %p1430_p9 = scmp.lt.u32.totalorder %s1426_s16, %s1946_s3 }
  0x1c   :  { %p1432_p10 = pnand %p1430_p9, %p1427_p8 }
  0x1e   :  { %1435 = shalt.err (!%p1432_p10)
}
  0x1f   :  { %s1436_s23 = scalar_lea.vmem %s68_s20, 32  ;;  %p1441_p12 = scmp.lt.s32.totalorder %s68_s20, %s68_s20 }
  0x20   :  { %p1437_p11 = scmp.ne.s32.totalorder %s68_s20, %s1436_s23  ;;  %p1442_p13 = scmp.lt.s32.totalorder %s1436_s23, %s1436_s23 }
  0x22   :  { %p1443_p0 = por %p1442_p13, %p1441_p12 }
  0x24   :  { %p1444_p1 = pnand %p1443_p0, %p1437_p11 }
  0x26   :  { %1447 = shalt.err (!%p1444_p1)
}
  0x27   :  { %70 = dma.hbm_to_vmem [thread:$0]  %s1946_s3, 32, %s68_s20, [#allocation9]  }
  0x28   :  { %s1688_s24 = smov [#allocation11]   ;;  %s1689_s26 = smov [#allocation14]  }
  0x29   :  { %s89_s25 = sshll.u32 %s1688_s24, 4  ;;  %s111_s27 = sshll.u32 %s1689_s26, 4  ;;  %s90_s25 = int_to_ptr.vmem [resolvable:$true] %s89_s25  ;;  %s112_s27 = int_to_ptr.vmem [resolvable:$true] %s111_s27 }
  0x2a   :  { %s1448_s13 = scalar_lea.hbm %s1948_s5, 32 }
  0x2b   :  { %p1449_p2 = scmp.ne.s32.totalorder %s1948_s5, %s1448_s13  ;;  %p1452_p3 = scmp.lt.u32.totalorder %s1448_s13, %s1948_s5 }
  0x2d   :  { %p1454_p4 = pnand %p1452_p3, %p1449_p2 }
  0x2f   :  { %1457 = shalt.err (!%p1454_p4)
}
  0x30   :  { %s1458_s3 = scalar_lea.vmem %s90_s25, 32  ;;  %p1463_p6 = scmp.lt.s32.totalorder %s90_s25, %s90_s25 }
  0x31   :  { %p1459_p5 = scmp.ne.s32.totalorder %s90_s25, %s1458_s3  ;;  %p1464_p7 = scmp.lt.s32.totalorder %s1458_s3, %s1458_s3 }
  0x33   :  { %p1465_p8 = por %p1464_p7, %p1463_p6 }
  0x35   :  { %p1466_p9 = pnand %p1465_p8, %p1459_p5 }
  0x37   :  { %1469 = shalt.err (!%p1466_p9)
}
  0x38   :  { %92 = dma.hbm_to_vmem [thread:$0]  %s1948_s5, 32, %s90_s25, [#allocation12]  }
  0x39   :  { %s1470_s23 = scalar_lea.hbm %s1950_s7, 16 }
  0x3a   :  { %p1471_p10 = scmp.ne.s32.totalorder %s1950_s7, %s1470_s23  ;;  %p1474_p11 = scmp.lt.u32.totalorder %s1470_s23, %s1950_s7 }
  0x3c   :  { %p1476_p12 = pnand %p1474_p11, %p1471_p10 }
  0x3e   :  { %1479 = shalt.err (!%p1476_p12)
}
  0x3f   :  { %s1480_s28 = scalar_lea.vmem %s112_s27, 16  ;;  %s1484_s12 = scalar_lea.vmem %s112_s27, 32 }
  0x40   :  { %p1481_p13 = scmp.ne.s32.totalorder %s112_s27, %s1480_s28  ;;  %p1485_p0 = scmp.lt.s32.totalorder %s112_s27, %s112_s27 }
  0x41   :  { %p1486_p1 = scmp.lt.s32.totalorder %s1484_s12, %s1480_s28 }
  0x43   :  { %p1487_p2 = por %p1486_p1, %p1485_p0 }
  0x45   :  { %p1488_p3 = pnand %p1487_p2, %p1481_p13 }
  0x47   :  { %1491 = shalt.err (!%p1488_p3)
}
  0x48   :  { %114 = dma.hbm_to_vmem [thread:$0]  %s1950_s7, 16, %s112_s27, [#allocation15]  }
  0x49   :  { %s1690_s13 = smov [#allocation2]   ;;  %s1691_s15 = smov [#allocation7]  }
  0x4a   :  { %s30_s14 = sshll.u32 %s1690_s13, 4  ;;  %s54_s16 = sshll.u32 %s1691_s15, 4  ;;  %s31_s14 = int_to_ptr.vmem [resolvable:$true] %s30_s14  ;;  %s1811_s16 = int_to_ptr.vmem [resolvable:$true] %s54_s16 }
  0x4b   :  { %s1492_s20 = scalar_lea.hbm %s1943_s0, 256 }
  0x4c   :  { %p1493_p4 = scmp.ne.s32.totalorder %s1943_s0, %s1492_s20  ;;  %p1496_p5 = scmp.lt.u32.totalorder %s1492_s20, %s1943_s0 }
  0x4e   :  { %p1498_p6 = pnand %p1496_p5, %p1493_p4 }
  0x50   :  { %1501 = shalt.err (!%p1498_p6)
}
  0x51   :  { %s1502_s7 = scalar_lea.vmem %s31_s14, 256  ;;  %p1507_p8 = scmp.lt.s32.totalorder %s31_s14, %s31_s14 }
  0x52   :  { %p1503_p7 = scmp.ne.s32.totalorder %s31_s14, %s1502_s7  ;;  %p1508_p9 = scmp.lt.s32.totalorder %s1502_s7, %s1502_s7 }
  0x54   :  { %p1509_p10 = por %p1508_p9, %p1507_p8 }
  0x56   :  { %p1510_p11 = pnand %p1509_p10, %p1503_p7 }
  0x58   :  { %1513 = shalt.err (!%p1510_p11)
}
  0x59   :  { %36 = dma.hbm_to_vmem [thread:$0]  %s1943_s0, 256, %s31_s14, [#allocation3], %s1686_s29, %s1686_s29, %s1687_s30  }
  0x5a   :  { %s1514_s26 = scalar_lea.hbm %s1945_s2, 4096 }
  0x5b   :  { %p1515_p12 = scmp.ne.s32.totalorder %s1945_s2, %s1514_s26  ;;  %p1518_p13 = scmp.lt.u32.totalorder %s1514_s26, %s1945_s2 }
  0x5d   :  { %p1520_p0 = pnand %p1518_p13, %p1515_p12 }
  0x5f   :  { %1523 = shalt.err (!%p1520_p0)
}
  0x60   :  { %s1524_s13 = scalar_lea.vmem %s1811_s16, 4096  ;;  %p1529_p2 = scmp.lt.s32.totalorder %s1811_s16, %s1811_s16 }
  0x61   :  { %p1525_p1 = scmp.ne.s32.totalorder %s1811_s16, %s1524_s13  ;;  %p1530_p3 = scmp.lt.s32.totalorder %s1524_s13, %s1524_s13 }
  0x63   :  { %p1531_p4 = por %p1530_p3, %p1529_p2 }
  0x65   :  { %p1532_p5 = pnand %p1531_p4, %p1525_p1 }
  0x67   :  { %1535 = shalt.err (!%p1532_p5)
}
  0x68   :  { %60 = dma.hbm_to_vmem [thread:$0]  %s1945_s2, 4096, %s1811_s16, [#allocation6], %s1686_s29, %s1686_s29, %s1687_s30  }
  0x69   :  { %s1692_s15 = smov [#allocation10]   ;;  %s1693_s3 = smov [#allocation13]  }
  0x6a   :  { %s76_s17 = sshll.u32 %s1692_s15, 4  ;;  %s98_s20 = sshll.u32 %s1693_s3, 4  ;;  %s77_s17 = int_to_ptr.vmem [resolvable:$true] %s76_s17  ;;  %s1848_s20 = int_to_ptr.vmem [resolvable:$true] %s98_s20 }
  0x6b   :  { %s1536_s22 = scalar_lea.hbm %s1947_s4, 4096 }
  0x6c   :  { %p1537_p6 = scmp.ne.s32.totalorder %s1947_s4, %s1536_s22  ;;  %p1540_p7 = scmp.lt.u32.totalorder %s1536_s22, %s1947_s4 }
  0x6e   :  { %p1542_p8 = pnand %p1540_p7, %p1537_p6 }
  0x70   :  { %1545 = shalt.err (!%p1542_p8)
}
  0x71   :  { %s1546_s2 = scalar_lea.vmem %s77_s17, 4096  ;;  %p1551_p10 = scmp.lt.s32.totalorder %s77_s17, %s77_s17 }
  0x72   :  { %p1547_p9 = scmp.ne.s32.totalorder %s77_s17, %s1546_s2  ;;  %p1552_p11 = scmp.lt.s32.totalorder %s1546_s2, %s1546_s2 }
  0x74   :  { %p1553_p12 = por %p1552_p11, %p1551_p10 }
  0x76   :  { %p1554_p13 = pnand %p1553_p12, %p1547_p9 }
  0x78   :  { %1557 = shalt.err (!%p1554_p13)
}
  0x79   :  { %82 = dma.hbm_to_vmem [thread:$0]  %s1947_s4, 4096, %s77_s17, [#allocation9], %s1686_s29, %s1686_s29, %s1687_s30  }
  0x7a   :  { %s1558_s28 = scalar_lea.hbm %s1949_s6, 2048 }
  0x7b   :  { %p1559_p0 = scmp.ne.s32.totalorder %s1949_s6, %s1558_s28  ;;  %p1562_p1 = scmp.lt.u32.totalorder %s1558_s28, %s1949_s6 }
  0x7d   :  { %p1564_p2 = pnand %p1562_p1, %p1559_p0 }
  0x7f   :  { %1567 = shalt.err (!%p1564_p2)
}
  0x80   :  { %s1568_s0 = scalar_lea.vmem %s1848_s20, 2048  ;;  %p1573_p4 = scmp.lt.s32.totalorder %s1848_s20, %s1848_s20 }
  0x81   :  { %p1569_p3 = scmp.ne.s32.totalorder %s1848_s20, %s1568_s0  ;;  %p1574_p5 = scmp.lt.s32.totalorder %s1568_s0, %s1568_s0 }
  0x83   :  { %p1575_p6 = por %p1574_p5, %p1573_p4 }
  0x85   :  { %p1576_p7 = pnand %p1575_p6, %p1569_p3 }
  0x87   :  { %1579 = shalt.err (!%p1576_p7)
}
  0x88   :  { %s1694_s4 = smov 64   ;;  %s1695_s14 = smov 4  }
  0x89   :  { %104 = dma.hbm_to_vmem [thread:$0]  %s1949_s6, 2048, %s1848_s20, [#allocation12], %s1694_s4, %s1694_s4, %s1695_s14  }
  0x8a   :  { %s1696_s3 = smov [#allocation16]   ;;  %s1697_s21 = smov [#allocation17]  }
  0x8b   :  { %s120_s19 = sshll.u32 %s1696_s3, 4  ;;  %s133_s22 = sshll.u32 %s1697_s21, 4  ;;  %s121_s19 = int_to_ptr.vmem [resolvable:$true] %s120_s19  ;;  %s134_s22 = int_to_ptr.vmem [resolvable:$true] %s133_s22 }
  0x8c   :  { %s1580_s27 = scalar_lea.hbm %s1951_s8, 2048 }
  0x8d   :  { %p1581_p8 = scmp.ne.s32.totalorder %s1951_s8, %s1580_s27  ;;  %p1584_p9 = scmp.lt.u32.totalorder %s1580_s27, %s1951_s8 }
  0x8f   :  { %p1586_p10 = pnand %p1584_p9, %p1581_p8 }
  0x91   :  { %1589 = shalt.err (!%p1586_p10)
}
  0x92   :  { %s1590_s6 = scalar_lea.vmem %s121_s19, 2048  ;;  %p1595_p12 = scmp.lt.s32.totalorder %s121_s19, %s121_s19 }
  0x93   :  { %p1591_p11 = scmp.ne.s32.totalorder %s121_s19, %s1590_s6  ;;  %p1596_p13 = scmp.lt.s32.totalorder %s1590_s6, %s1590_s6 }
  0x95   :  { %p1597_p0 = por %p1596_p13, %p1595_p12 }
  0x97   :  { %p1598_p1 = pnand %p1597_p0, %p1591_p11 }
  0x99   :  { %1601 = shalt.err (!%p1598_p1)
}
  0x9a   :  { %126 = dma.hbm_to_vmem [thread:$0]  %s1951_s8, 2048, %s121_s19, [#allocation15], %s1694_s4, %s1694_s4, %s1695_s14  }
  0x9b   :  { %s1602_s12 = scalar_lea.hbm %s1952_s9, 16 }
  0x9c   :  { %p1603_p2 = scmp.ne.s32.totalorder %s1952_s9, %s1602_s12  ;;  %p1606_p3 = scmp.lt.u32.totalorder %s1602_s12, %s1952_s9 }
  0x9e   :  { %p1608_p4 = pnand %p1606_p3, %p1603_p2 }
  0xa0   :  { %1611 = shalt.err (!%p1608_p4)
}
  0xa1   :  { %s1612_s15 = scalar_lea.vmem %s134_s22, 16  ;;  %s1616_s17 = scalar_lea.vmem %s134_s22, 32 }
  0xa2   :  { %p1613_p5 = scmp.ne.s32.totalorder %s134_s22, %s1612_s15  ;;  %p1617_p6 = scmp.lt.s32.totalorder %s134_s22, %s134_s22 }
  0xa3   :  { %p1618_p7 = scmp.lt.s32.totalorder %s1616_s17, %s1612_s15 }
  0xa5   :  { %p1619_p8 = por %p1618_p7, %p1617_p6 }
  0xa7   :  { %p1620_p9 = pnand %p1619_p8, %p1613_p5 }
  0xa9   :  { %1623 = shalt.err (!%p1620_p9)
}
  0xaa   :  { %136 = dma.hbm_to_vmem [thread:$0]  %s1952_s9, 16, %s134_s22, [#allocation18]  }
  0xab   :  { %1668 = dma.done.wait [#allocation3], 256  }
  0xac   :  { %1669 = vsyncadd [#allocation3], 4294967040 }
  0xad   :  { %1670 = dma.done.wait [#allocation6], 4352  }
  0xae   :  { %1671 = vsyncadd [#allocation6], 4294962944 }
  0xaf   :  { %1672 = dma.done.wait [#allocation9], 4128  }
  0xb0   :  { %1673 = vsyncadd [#allocation9], 4294963168 }
  0xb1   :  { %1674 = dma.done.wait [#allocation12], 2080  }
  0xb2   :  { %1675 = vsyncadd [#allocation12], 4294965216 }
  0xb3   :  { %1676 = dma.done.wait [#allocation15], 2064  }
  0xb4   :  { %1677 = vsyncadd [#allocation15], 4294965232 }
  0xb5   :  { %1678 = dma.done.wait [#allocation18], 16  }
  0xb6   :  { %1679 = vsyncadd [#allocation18], 4294967280  ;;  %v1254_v0 = vld [vmem:[#allocation7 + $0x4] ss:$8 sps:$4 sm:$0xff]   ;;  %v1258_v2 = vld [vmem:[#allocation7] ss:$8 sps:$4 sm:$0xff]  }
  0xb7   :  { %v1256_v1 = vld [vmem:[#allocation10 + $0x4] ss:$8 sps:$4 sm:$0xff]   ;;  %384 = vmatprep.subr.bf16.mxu0 %v1254_v0  ;;  %v1259_v3 = vld [vmem:[#allocation10] ss:$8 sps:$4 sm:$0xff]   ;;  %v1260_v4 = vld [vmem:[#allocation7 + $0x14] ss:$8 sps:$4 sm:$0xff]  }
  0xb8   :  { %647 = vmatprep.subr.bf16.mxu1 %v1256_v1  ;;  %385 = vmatpush1.bf16.msra.mxu0 %v1258_v2  ;;  %v1262_v5 = vld [vmem:[#allocation10 + $0x14] ss:$8 sps:$4 sm:$0xff]   ;;  %v1265_v7 = vld [vmem:[#allocation10 + $0x10] ss:$8 sps:$4 sm:$0xff]   ;;  %v1266_v8 = vld [vmem:[#allocation7 + $0x24] ss:$8 sps:$4 sm:$0xff]  }
  0xb9   :  { %648 = vmatpush1.bf16.msra.mxu1 %v1259_v3  ;;  %v1264_v6 = vld [vmem:[#allocation7 + $0x10] ss:$8 sps:$4 sm:$0xff]   ;;  %386 = vmatprep.subr.bf16.mxu0 %v1260_v4  ;;  %v1270_v10 = vld [vmem:[#allocation7 + $0x20] ss:$8 sps:$4 sm:$0xff]   ;;  %v1272_v12 = vld [vmem:[#allocation7 + $0x34] ss:$8 sps:$4 sm:$0xff]  }
  0xba   :  { %649 = vmatprep.subr.bf16.mxu1 %v1262_v5  ;;  %v1268_v9 = vld [vmem:[#allocation10 + $0x24] ss:$8 sps:$4 sm:$0xff]   ;;  %v1271_v11 = vld [vmem:[#allocation10 + $0x20] ss:$8 sps:$4 sm:$0xff]   ;;  %v1274_v13 = vld [vmem:[#allocation10 + $0x34] ss:$8 sps:$4 sm:$0xff]  }
  0xbb   :  { %v1276_v14 = vld [vmem:[#allocation7 + $0x30] ss:$8 sps:$4 sm:$0xff]   ;;  %v1278_v16 = vld [vmem:[#allocation7 + $0x44] ss:$8 sps:$4 sm:$0xff]   ;;  %v1282_v18 = vld [vmem:[#allocation7 + $0x40] ss:$8 sps:$4 sm:$0xff]  }
  0xbc   :  { %387 = vmatpush1.bf16.msra.mxu0 %v1264_v6  ;;  %v1277_v15 = vld [vmem:[#allocation10 + $0x30] ss:$8 sps:$4 sm:$0xff]   ;;  %v1280_v17 = vld [vmem:[#allocation10 + $0x44] ss:$8 sps:$4 sm:$0xff]   ;;  %v1283_v19 = vld [vmem:[#allocation10 + $0x40] ss:$8 sps:$4 sm:$0xff]  }
  0xbd   :  { %650 = vmatpush1.bf16.msra.mxu1 %v1265_v7  ;;  %388 = vmatprep.subr.bf16.mxu0 %v1266_v8  ;;  %v1284_v20 = vld [vmem:[#allocation7 + $0x54] ss:$8 sps:$4 sm:$0xff]   ;;  %v1288_v22 = vld [vmem:[#allocation7 + $0x50] ss:$8 sps:$4 sm:$0xff]   ;;  %v1290_v24 = vld [vmem:[#allocation7 + $0x64] ss:$8 sps:$4 sm:$0xff]  }
  0xbe   :  { %651 = vmatprep.subr.bf16.mxu1 %v1268_v9  ;;  %v1286_v21 = vld [vmem:[#allocation10 + $0x54] ss:$8 sps:$4 sm:$0xff]   ;;  %v1289_v23 = vld [vmem:[#allocation10 + $0x50] ss:$8 sps:$4 sm:$0xff]   ;;  %v1292_v25 = vld [vmem:[#allocation10 + $0x64] ss:$8 sps:$4 sm:$0xff]  }
  0xbf   :  { %v1294_v26 = vld [vmem:[#allocation7 + $0x60] ss:$8 sps:$4 sm:$0xff]   ;;  %v1296_v28 = vld [vmem:[#allocation7 + $0x74] ss:$8 sps:$4 sm:$0xff]   ;;  %v1300_v30 = vld [vmem:[#allocation7 + $0x70] ss:$8 sps:$4 sm:$0xff]  }
  0xc0   :  { %389 = vmatpush1.bf16.msra.mxu0 %v1270_v10  ;;  %v1295_v27 = vld [vmem:[#allocation10 + $0x60] ss:$8 sps:$4 sm:$0xff]   ;;  %v1298_v29 = vld [vmem:[#allocation10 + $0x74] ss:$8 sps:$4 sm:$0xff]   ;;  %v1301_v31 = vld [vmem:[#allocation10 + $0x70] ss:$8 sps:$4 sm:$0xff]  }
  0xc1   :  { %652 = vmatpush1.bf16.msra.mxu1 %v1271_v11  ;;  %390 = vmatprep.subr.bf16.mxu0 %v1272_v12  ;;  %v1302_v32 = vld [vmem:[#allocation7 + $0x84] ss:$8 sps:$4 sm:$0xff]   ;;  %v1306_v34 = vld [vmem:[#allocation7 + $0x80] ss:$8 sps:$4 sm:$0xff]   ;;  %v1308_v36 = vld [vmem:[#allocation7 + $0x94] ss:$8 sps:$4 sm:$0xff]  }
  0xc2   :  { %653 = vmatprep.subr.bf16.mxu1 %v1274_v13  ;;  %v1304_v33 = vld [vmem:[#allocation10 + $0x84] ss:$8 sps:$4 sm:$0xff]   ;;  %v1307_v35 = vld [vmem:[#allocation10 + $0x80] ss:$8 sps:$4 sm:$0xff]   ;;  %v1310_v37 = vld [vmem:[#allocation10 + $0x94] ss:$8 sps:$4 sm:$0xff]  }
  0xc3   :  { %v1312_v38 = vld [vmem:[#allocation7 + $0x90] ss:$8 sps:$4 sm:$0xff]   ;;  %v1314_v40 = vld [vmem:[#allocation7 + $0xa4] ss:$8 sps:$4 sm:$0xff]   ;;  %v1318_v42 = vld [vmem:[#allocation7 + $0xa0] ss:$8 sps:$4 sm:$0xff]  }
  0xc4   :  { %391 = vmatpush1.bf16.msra.mxu0 %v1276_v14  ;;  %v1313_v39 = vld [vmem:[#allocation10 + $0x90] ss:$8 sps:$4 sm:$0xff]   ;;  %v1316_v41 = vld [vmem:[#allocation10 + $0xa4] ss:$8 sps:$4 sm:$0xff]   ;;  %v1319_v43 = vld [vmem:[#allocation10 + $0xa0] ss:$8 sps:$4 sm:$0xff]  }
  0xc5   :  { %654 = vmatpush1.bf16.msra.mxu1 %v1277_v15  ;;  %392 = vmatprep.subr.bf16.mxu0 %v1278_v16  ;;  %v1320_v44 = vld [vmem:[#allocation7 + $0xb4] ss:$8 sps:$4 sm:$0xff]   ;;  %v1324_v46 = vld [vmem:[#allocation7 + $0xb0] ss:$8 sps:$4 sm:$0xff]   ;;  %v1326_v48 = vld [vmem:[#allocation7 + $0xc4] ss:$8 sps:$4 sm:$0xff]  }
  0xc6   :  { %655 = vmatprep.subr.bf16.mxu1 %v1280_v17  ;;  %v1322_v45 = vld [vmem:[#allocation10 + $0xb4] ss:$8 sps:$4 sm:$0xff]   ;;  %v1325_v47 = vld [vmem:[#allocation10 + $0xb0] ss:$8 sps:$4 sm:$0xff]   ;;  %v1352_v49 = vld [vmem:[#allocation2 + $0x4] ss:$8 sps:$4 sm:$0xff]  }
  0xc7   :  { %v1328_v50 = vld [vmem:[#allocation10 + $0xc4] ss:$8 sps:$4 sm:$0xff]   ;;  %v1355_v51 = vld [vmem:[#allocation5 + $0x4] ss:$8 sps:$4 sm:$0xff]   ;;  %416 = vmatprep.mubr.bf16.mxu0 %v1352_v49  ;;  %v1331_v53 = vld [vmem:[#allocation10 + $0xc0] ss:$8 sps:$4 sm:$0xff]  }
  0xc8   :  { %393 = vmatpush1.bf16.msra.mxu0 %v1282_v18  ;;  %v1330_v52 = vld [vmem:[#allocation7 + $0xc0] ss:$8 sps:$4 sm:$0xff]   ;;  %679 = vmatprep.mubr.bf16.mxu1 %v1355_v51  ;;  %v1332_v54 = vld [vmem:[#allocation7 + $0xd4] ss:$8 sps:$4 sm:$0xff]   ;;  %v1336_v56 = vld [vmem:[#allocation7 + $0xd0] ss:$8 sps:$4 sm:$0xff]  }
  0xc9   :  { %656 = vmatpush1.bf16.msra.mxu1 %v1283_v19  ;;  %394 = vmatprep.subr.bf16.mxu0 %v1284_v20  ;;  %v1334_v55 = vld [vmem:[#allocation10 + $0xd4] ss:$8 sps:$4 sm:$0xff]   ;;  %v1337_v57 = vld [vmem:[#allocation10 + $0xd0] ss:$8 sps:$4 sm:$0xff]   ;;  %v1338_v58 = vld [vmem:[#allocation7 + $0xe4] ss:$8 sps:$4 sm:$0xff]  }
  0xca   :  { %657 = vmatprep.subr.bf16.mxu1 %v1286_v21  ;;  %v1340_v59 = vld [vmem:[#allocation10 + $0xe4] ss:$8 sps:$4 sm:$0xff]   ;;  %v1343_v61 = vld [vmem:[#allocation10 + $0xe0] ss:$8 sps:$4 sm:$0xff]   ;;  %v1344_v62 = vld [vmem:[#allocation7 + $0xf4] ss:$8 sps:$4 sm:$0xff]  }
  0xcb   :  { %v1342_v60 = vld [vmem:[#allocation7 + $0xe0] ss:$8 sps:$4 sm:$0xff]   ;;  %v1348_v0 = vld [vmem:[#allocation7 + $0xf0] ss:$8 sps:$4 sm:$0xff]   ;;  %s1698_s9 = smov [#allocation19]   ;;  %s1699_s3 = smov [#allocation20]  }
  0xcc   :  { %395 = vmatpush1.bf16.msra.mxu0 %v1288_v22  ;;  %v1346_v63 = vld [vmem:[#allocation10 + $0xf4] ss:$8 sps:$4 sm:$0xff]   ;;  %v1349_v1 = vld [vmem:[#allocation10 + $0xf0] ss:$8 sps:$4 sm:$0xff]   ;;  %v1356_v2 = vld [vmem:[#allocation13 + $0x40] sm:$0xff]   ;;  %s1059_s14 = sshll.u32 %s1698_s9, 4  ;;  %s1060_s14 = int_to_ptr.vmem [resolvable:$true] %s1059_s14 }
  0xcd   :  { %658 = vmatpush1.bf16.msra.mxu1 %v1289_v23  ;;  %396 = vmatprep.subr.bf16.mxu0 %v1290_v24  ;;  %v1357_v3 = vld [vmem:[#allocation16 + $0x40] sm:$0xff]   ;;  %v1353_v5 = vld [vmem:[#allocation5] ss:$8 sps:$4 sm:$0xff]   ;;  %v1368_v16 = vld [vmem:[#allocation13 + $0x58] sm:$0xff]   ;;  %s1071_s19 = sshll.u32 %s1699_s3, 4  ;;  %s1624_s21 = scalar_lea.vmem %s1060_s14, 256  ;;  %s1906_s19 = int_to_ptr.vmem [resolvable:$true] %s1071_s19 }
  0xce   :  { %659 = vmatprep.subr.bf16.mxu1 %v1292_v25  ;;  %v1350_v4 = vld [vmem:[#allocation2] ss:$8 sps:$4 sm:$0xff]   ;;  %v1360_v8 = vld [vmem:[#allocation13 + $0x48] sm:$0xff]   ;;  %v1364_v12 = vld [vmem:[#allocation13 + $0x50] sm:$0xff]   ;;  %p1625_p10 = scmp.ne.s32.totalorder %s1060_s14, %s1624_s21  ;;  %p1629_p11 = scmp.lt.s32.totalorder %s1060_s14, %s1060_s14 }
  0xcf   :  { %v1358_v6 = vld [vmem:[#allocation13] sm:$0xff]   ;;  %v1361_v9 = vld [vmem:[#allocation16 + $0x48] sm:$0xff]   ;;  %v1365_v13 = vld [vmem:[#allocation16 + $0x50] sm:$0xff]   ;;  %p1630_p12 = scmp.lt.s32.totalorder %s1624_s21, %s1624_s21 }
  0xd0   :  { %397 = vmatpush1.bf16.msra.mxu0 %v1294_v26  ;;  %v1359_v7 = vld [vmem:[#allocation16] sm:$0xff]   ;;  %v1363_v11 = vld [vmem:[#allocation16 + $0x8] sm:$0xff]   ;;  %v1367_v15 = vld [vmem:[#allocation16 + $0x10] sm:$0xff]  }
  0xd1   :  { %660 = vmatpush1.bf16.msra.mxu1 %v1295_v27  ;;  %398 = vmatprep.subr.bf16.mxu0 %v1296_v28  ;;  %v1362_v10 = vld [vmem:[#allocation13 + $0x8] sm:$0xff]   ;;  %v1366_v14 = vld [vmem:[#allocation13 + $0x10] sm:$0xff]   ;;  %v1369_v17 = vld [vmem:[#allocation16 + $0x58] sm:$0xff]   ;;  %p1631_p13 = por %p1630_p12, %p1629_p11 }
  0xd2   :  { %661 = vmatprep.subr.bf16.mxu1 %v1298_v29  ;;  %v1370_v18 = vld [vmem:[#allocation13 + $0x18] sm:$0xff]   ;;  %v1372_v20 = vld [vmem:[#allocation13 + $0x60] sm:$0xff]   ;;  %v1376_v24 = vld [vmem:[#allocation13 + $0x68] sm:$0xff]  }
  0xd3   :  { %v1371_v19 = vld [vmem:[#allocation16 + $0x18] sm:$0xff]   ;;  %v1373_v21 = vld [vmem:[#allocation16 + $0x60] sm:$0xff]   ;;  %v1377_v25 = vld [vmem:[#allocation16 + $0x68] sm:$0xff]   ;;  %p1632_p0 = pnand %p1631_p13, %p1625_p10 }
  0xd4   :  { %399 = vmatpush1.bf16.msra.mxu0 %v1300_v30  ;;  %v1374_v22 = vld [vmem:[#allocation13 + $0x20] sm:$0xff]   ;;  %v1378_v26 = vld [vmem:[#allocation13 + $0x28] sm:$0xff]   ;;  %v1380_v28 = vld [vmem:[#allocation13 + $0x70] sm:$0xff]  }
  0xd5   :  { %662 = vmatpush1.bf16.msra.mxu1 %v1301_v31  ;;  %400 = vmatprep.subr.bf16.mxu0 %v1302_v32  ;;  %v1375_v23 = vld [vmem:[#allocation16 + $0x20] sm:$0xff]   ;;  %v1379_v27 = vld [vmem:[#allocation16 + $0x28] sm:$0xff]   ;;  %v1381_v29 = vld [vmem:[#allocation16 + $0x70] sm:$0xff]  }
  0xd6   :  { %663 = vmatprep.subr.bf16.mxu1 %v1304_v33  ;;  %v1382_v30 = vld [vmem:[#allocation13 + $0x30] sm:$0xff]   ;;  %v1384_v32 = vld [vmem:[#allocation13 + $0x78] sm:$0xff]  }
  0xd7   :  { %v1383_v31 = vld [vmem:[#allocation16 + $0x30] sm:$0xff]   ;;  %v1385_v33 = vld [vmem:[#allocation16 + $0x78] sm:$0xff]  }
  0xd8   :  { %401 = vmatpush1.bf16.msra.mxu0 %v1306_v34  ;;  %v1386_v34 = vld [vmem:[#allocation13 + $0x38] sm:$0xff]  }
  0xd9   :  { %664 = vmatpush1.bf16.msra.mxu1 %v1307_v35  ;;  %402 = vmatprep.subr.bf16.mxu0 %v1308_v36  ;;  %v1387_v35 = vld [vmem:[#allocation16 + $0x38] sm:$0xff]   ;;  %v204_v36 = vlaneseq }
  0xda   :  { %665 = vmatprep.subr.bf16.mxu1 %v1310_v37 }
  0xdb   :  { %v205_v37 = vshrl.u32 %v204_v36, 7 }
  0xdc   :  { %403 = vmatpush1.bf16.msra.mxu0 %v1312_v38 }
  0xdd   :  { %666 = vmatpush1.bf16.msra.mxu1 %v1313_v39  ;;  %404 = vmatprep.subr.bf16.mxu0 %v1314_v40  ;;  %v206_v38 = vsub.s32 0, %v205_v37  ;;  %v202_v39 = vld [vmem:[#allocation8] sm:$0x3]  ;;  %v465_v40 = vld [vmem:[#allocation11] sm:$0x3] }
  0xde   :  { %667 = vmatprep.subr.bf16.mxu1 %v1316_v41  ;;  %v210_v41 = vsub.s32 1, %v205_v37 }
  0xe0   :  { %405 = vmatpush1.bf16.msra.mxu0 %v1318_v42  ;;  %v207_v42 = vrot.slane %v202_v39, %v206_v38 }
  0xe1   :  { %668 = vmatpush1.bf16.msra.mxu1 %v1319_v43  ;;  %406 = vmatprep.subr.bf16.mxu0 %v1320_v44  ;;  %v470_v43 = vrot.slane %v465_v40, %v206_v38  ;;  %v211_v44 = vrot.slane %v202_v39, %v210_v41 }
  0xe2   :  { %669 = vmatprep.subr.bf16.mxu1 %v1322_v45  ;;  %v474_v45 = vrot.slane %v465_v40, %v210_v41 }
  0xe4   :  { %407 = vmatpush1.bf16.msra.mxu0 %v1324_v46 }
  0xe5   :  { %670 = vmatpush1.bf16.msra.mxu1 %v1325_v47  ;;  %408 = vmatprep.subr.bf16.mxu0 %v1326_v48 }
  0xe6   :  { %671 = vmatprep.subr.bf16.mxu1 %v1328_v50 }
  0xe8   :  { %409 = vmatpush1.bf16.msra.mxu0 %v1330_v52 }
  0xe9   :  { %672 = vmatpush1.bf16.msra.mxu1 %v1331_v53  ;;  %410 = vmatprep.subr.bf16.mxu0 %v1332_v54 }
  0xea   :  { %673 = vmatprep.subr.bf16.mxu1 %v1334_v55 }
  0xec   :  { %411 = vmatpush1.bf16.msra.mxu0 %v1336_v56 }
  0xed   :  { %674 = vmatpush1.bf16.msra.mxu1 %v1337_v57  ;;  %412 = vmatprep.subr.bf16.mxu0 %v1338_v58 }
  0xee   :  { %675 = vmatprep.subr.bf16.mxu1 %v1340_v59 }
  0xf0   :  { %413 = vmatpush1.bf16.msra.mxu0 %v1342_v60 }
  0xf1   :  { %676 = vmatpush1.bf16.msra.mxu1 %v1343_v61  ;;  %414 = vmatprep.subr.bf16.mxu0 %v1344_v62 }
  0xf2   :  { %677 = vmatprep.subr.bf16.mxu1 %v1346_v63 }
  0xf4   :  { %415 = vmatpush1.bf16.msra.mxu0 %v1348_v0 }
  0xf5   :  { %678 = vmatpush1.bf16.msra.mxu1 %v1349_v1  ;;  %1194 = vmatprep.subr.bf16.mxu0 %v1356_v2 }
  0xf6   :  { %1216 = vmatprep.subr.bf16.mxu1 %v1357_v3 }
  0xf7   :  { %417 = vmatmul.mubr.bf16.vlgmr.msra.gmra.mrb[0].mxu0 %v1350_v4 }
  0xf8   :  { %680 = vmatmul.mubr.bf16.vlgmr.msra.gmra.mrb[0].mxu1 %v1353_v5  ;;  %1195 = vmatpush3.bf16.msra.mxu0 %v1358_v6 }
  0xf9   :  { %1217 = vmatpush3.bf16.msra.mxu1 %v1359_v7  ;;  %1196 = vmatprep.subr.bf16.mxu0 %v1360_v8 }
  0xfa   :  { %1218 = vmatprep.subr.bf16.mxu1 %v1361_v9 }
  0xfc   :  { %1197 = vmatpush3.bf16.msra.mxu0 %v1362_v10 }
  0xfd   :  { %1219 = vmatpush3.bf16.msra.mxu1 %v1363_v11  ;;  %1198 = vmatprep.subr.bf16.mxu0 %v1364_v12  ;;  %v1160_v12 = vld [vmem:[#allocation14] ss:$0 sm:$0xff] }
  0xfe   :  { %1220 = vmatprep.subr.bf16.mxu1 %v1365_v13 }
 0x100   :  { %1199 = vmatpush3.bf16.msra.mxu0 %v1366_v14 }
 0x101   :  { %1221 = vmatpush3.bf16.msra.mxu1 %v1367_v15  ;;  %1200 = vmatprep.subr.bf16.mxu0 %v1368_v16  ;;  %v1177_v15 = vld [vmem:[#allocation17] ss:$0 sm:$0xff] }
 0x102   :  { %1222 = vmatprep.subr.bf16.mxu1 %v1369_v17 }
 0x104   :  { %1201 = vmatpush3.bf16.msra.mxu0 %v1370_v18 }
 0x105   :  { %1223 = vmatpush3.bf16.msra.mxu1 %v1371_v19  ;;  %1202 = vmatprep.subr.bf16.mxu0 %v1372_v20 }
 0x106   :  { %1224 = vmatprep.subr.bf16.mxu1 %v1373_v21 }
 0x108   :  { %1203 = vmatpush3.bf16.msra.mxu0 %v1374_v22 }
 0x109   :  { %1225 = vmatpush3.bf16.msra.mxu1 %v1375_v23  ;;  %1204 = vmatprep.subr.bf16.mxu0 %v1376_v24 }
 0x10a   :  { %1226 = vmatprep.subr.bf16.mxu1 %v1377_v25 }
 0x10c   :  { %1205 = vmatpush3.bf16.msra.mxu0 %v1378_v26 }
 0x10d   :  { %1227 = vmatpush3.bf16.msra.mxu1 %v1379_v27  ;;  %1206 = vmatprep.subr.bf16.mxu0 %v1380_v28 }
 0x10e   :  { %1228 = vmatprep.subr.bf16.mxu1 %v1381_v29 }
 0x110   :  { %1207 = vmatpush3.bf16.msra.mxu0 %v1382_v30 }
 0x111   :  { %1229 = vmatpush3.bf16.msra.mxu1 %v1383_v31  ;;  %1208 = vmatprep.subr.bf16.mxu0 %v1384_v32 }
 0x112   :  { %1230 = vmatprep.subr.bf16.mxu1 %v1385_v33 }
 0x114   :  { %1209 = vmatpush3.bf16.msra.mxu0 %v1386_v34 }
 0x115   :  { %1231 = vmatpush3.bf16.msra.mxu1 %v1387_v35 }
 0x1ca   :  { %v418_v46 = vpop.f32.mrb[0].mxu0 }
 0x1cb   :  { %v681_v47 = vpop.f32.mrb[0].mxu1  ;;  %v419_v48 = vadd.f32 %v418_v46, %v207_v42  ;;  %v420_v50 = vpop.f32.mrb[1].mxu0 }
 0x1cc   :  { %v682_v49 = vadd.f32 %v681_v47, %v470_v43  ;;  %v683_v51 = vpop.f32.mrb[1].mxu1  ;;  %v421_v52 = vadd.f32 %v420_v50, %v211_v44  ;;  %v422_v54 = vpop.f32.mrb[2].mxu0 }
 0x1cd   :  { %v684_v53 = vadd.f32 %v683_v51, %v474_v45  ;;  %v685_v55 = vpop.f32.mrb[2].mxu1  ;;  %1388 = vtanh.f32 %v419_v48  ;;  %v423_v56 = vadd.f32 %v422_v54, %v207_v42  ;;  %v424_v57 = vpop.f32.mrb[3].mxu0 }
 0x1ce   :  { %v687_v58 = vpop.f32.mrb[3].mxu1  ;;  %1390 = vtanh.f32 %v682_v49  ;;  %v686_v59 = vadd.f32 %v685_v55, %v470_v43  ;;  %v425_v60 = vadd.f32 %v424_v57, %v211_v44 }
 0x1cf   :  { %1392 = vtanh.f32 %v421_v52  ;;  %v688_v61 = vadd.f32 %v687_v58, %v474_v45 }
 0x1d0   :  { %1394 = vtanh.f32 %v684_v53 }
 0x1d1   :  { %1396 = vtanh.f32 %v423_v56 }
 0x1d2   :  { %1398 = vtanh.f32 %v686_v59 }
 0x1d3   :  { %1400 = vtanh.f32 %v425_v60 }
 0x1d4   :  { %1402 = vtanh.f32 %v688_v61 }
 0x1d7   :  { %v1389_v62 = vpop.eup %1388 }
 0x1d8   :  { %v1391_v63 = vpop.eup %1390 }
 0x1d9   :  { %v1393_v0 = vpop.eup %1392 }
 0x1da   :  { %v1395_v1 = vpop.eup %1394 }
 0x1db   :  { %v1397_v2 = vpop.eup %1396 }
 0x1dc   :  { %v1399_v3 = vpop.eup %1398  ;;  %v694_v4 = vpack.c.bf16 %v1397_v2, %v1389_v62 }
 0x1dd   :  { %v1401_v5 = vpop.eup %1400  ;;  %v874_v6 = vpack.c.bf16 %v1399_v3, %v1391_v63 }
 0x1de   :  { %v1403_v7 = vpop.eup %1402  ;;  %v695_v8 = vpack.c.bf16 %v1401_v5, %v1393_v0 }
 0x1df   :  { %v875_v9 = vpack.c.bf16 %v1403_v7, %v1395_v1 }
 0x1e0   :  { %863 = vmatprep.mubr.bf16.mxu0 %v695_v8 }
 0x1e1   :  { %1043 = vmatprep.mubr.bf16.mxu1 %v875_v9  ;;  %864 = vmatmul.mubr.bf16.vlgmr.msra.gmra.mrb[4].mxu0 %v694_v4 }
 0x1e2   :  { %1044 = vmatmul.mubr.bf16.vlgmr.msra.gmra.mrb[4].mxu1 %v874_v6 }
 0x2b4   :  { %v1210_v10 = vpop.f32.mrb[4].mxu0 }
 0x2b5   :  { %v1232_v11 = vpop.f32.mrb[4].mxu1  ;;  %v1211_v13 = vpop.f32.mrb[5].mxu0 }
 0x2b6   :  { %v1212_v14 = vadd.f32 %v1211_v13, %v1210_v10  ;;  %v1233_v16 = vpop.f32.mrb[5].mxu1  ;;  %v1213_v17 = vpop.f32.mrb[6].mxu0 }
 0x2b7   :  { %v1234_v18 = vadd.f32 %v1233_v16, %v1232_v11  ;;  %v1235_v19 = vpop.f32.mrb[6].mxu1  ;;  %v1214_v20 = vpop.f32.mrb[7].mxu0 }
 0x2b8   :  { %v866_v21 = vadd.f32 %v1212_v14, %v1160_v12  ;;  %v1215_v22 = vadd.f32 %v1214_v20, %v1213_v17  ;;  %v1236_v23 = vpop.f32.mrb[7].mxu1 }
 0x2b9   :  { %v1046_v24 = vadd.f32 %v1234_v18, %v1177_v15  ;;  %v1237_v25 = vadd.f32 %v1236_v23, %v1235_v19 }
 0x2ba   :  { %872 = vst [vmem:[#allocation19] sm:$0xff] %v866_v21  ;;  %v869_v26 = vadd.f32 %v1215_v22, %v1160_v12 }
 0x2bb   :  { %1052 = vst [vmem:[#allocation20] sm:$0xff] %v1046_v24  ;;  %v1049_v27 = vadd.f32 %v1237_v25, %v1177_v15 }
 0x2bc   :  { %873 = vst [vmem:[#allocation19 + $0x8] sm:$0xff] %v869_v26 }
 0x2bd   :  { %1053 = vst [vmem:[#allocation20 + $0x8] sm:$0xff] %v1049_v27 }
 0x2be   :  { %1635 = shalt.err (!%p1632_p0)
}
 0x2bf   :  { %s1636_s7 = scalar_lea.hbm %s1953_s10, 256 }
 0x2c0   :  { %p1637_p1 = scmp.ne.s32.totalorder %s1953_s10, %s1636_s7  ;;  %p1640_p2 = scmp.lt.u32.totalorder %s1636_s7, %s1953_s10 }
 0x2c2   :  { %p1642_p3 = pnand %p1640_p2, %p1637_p1 }
 0x2c4   :  { %1645 = shalt.err (!%p1642_p3)
}
 0x2c5   :  { %1065 = dma.vmem_to_hbm [thread:$0]  %s1060_s14, 256, %s1953_s10, [#allocation4], %s1686_s29, %s1686_s29, %s1687_s30  }
 0x2c6   :  { %s1646_s20 = scalar_lea.vmem %s1906_s19, 256  ;;  %p1651_p5 = scmp.lt.s32.totalorder %s1906_s19, %s1906_s19 }
 0x2c7   :  { %p1647_p4 = scmp.ne.s32.totalorder %s1906_s19, %s1646_s20  ;;  %p1652_p6 = scmp.lt.s32.totalorder %s1646_s20, %s1646_s20 }
 0x2c9   :  { %p1653_p7 = por %p1652_p6, %p1651_p5 }
 0x2cb   :  { %p1654_p8 = pnand %p1653_p7, %p1647_p4 }
 0x2cd   :  { %1657 = shalt.err (!%p1654_p8)
}
 0x2ce   :  { %s1658_s28 = scalar_lea.hbm %s1954_s11, 256 }
 0x2cf   :  { %p1659_p9 = scmp.ne.s32.totalorder %s1954_s11, %s1658_s28  ;;  %p1662_p10 = scmp.lt.u32.totalorder %s1658_s28, %s1954_s11 }
 0x2d1   :  { %p1664_p11 = pnand %p1662_p10, %p1659_p9 }
 0x2d3   :  { %1667 = shalt.err (!%p1664_p11)
}
 0x2d4   :  { %1077 = dma.vmem_to_hbm [thread:$0]  %s1906_s19, 256, %s1954_s11, [#allocation21], %s1686_s29, %s1686_s29, %s1687_s30  }
 0x2d5   :  { %1680 = dma.done.wait [#allocation4], 256  }
 0x2d6   :  { %1681 = vsyncadd [#allocation4], 4294967040 }
 0x2d7   :  { %1682 = dma.done.wait [#allocation21], 256  }
 0x2d8   :  { %1683 = vsyncadd [#allocation21], 4294967040 }
 0x2d9   :  { %1084 = vsyncpa [#allocation3], 1 }
 0x2da   :  { %1085 = vsyncpa [#allocation6], 1 }
 0x2db   :  { %1086 = vsyncpa [#allocation9], 1 }
 0x2dc   :  { %1087 = vsyncpa [#allocation12], 1 }
 0x2dd   :  { %1088 = vsyncpa [#allocation15], 1 }
 0x2de   :  { %1089 = vsyncpa [#allocation18], 1 }
 0x2df   :  { %1090 = vsyncpa [#allocation4], 1 }
 0x2e0   :  { %1091 = vsyncpa [#allocation21], 1 }

</bundles_post_ra>
